<compile_context>
chip_gen: v5e
topology: v5e:2x2
jax: 0.10.0
libtpu: 0.0.40
codegen_flags: <defaults>
</compile_context>

<pallas_src>
import jax
import jax.numpy as jnp
from jax.experimental import pallas as pl
from jax.experimental.pallas import tpu as pltpu


_LANE_CANDIDATES = (8192, 4096, 2048, 1024, 512, 256, 128)
# ~2 MiB per f32 block; x4 for double-buffered in+out = ~8 MiB VMEM.
_TARGET_BLOCK_ELEMS = 512 * 1024


def _mish_kernel(x_ref, o_ref):
    x = x_ref[...].astype(jnp.float32)
    # mish(x) = x * tanh(softplus(x)) = x * e(e+2) / (e(e+2) + 2),  e = exp(x)
    # Clamp before exp so no inf/NaN is ever produced; for x > 20,
    # tanh(softplus(x)) == 1 to f32 precision, so mish(x) == x there.
    e = jnp.exp(jnp.minimum(x, 20.0))
    num = e * (e + 2.0)
    t = num / (num + 2.0)  # one vrcp on the EUP + cheap VALU refinement
    y = jnp.where(x > 20.0, x, x * t)
    o_ref[...] = y.astype(o_ref.dtype)


def _pick_lane(n):
    for lane in _LANE_CANDIDATES:
        if n % lane == 0:
            return lane
    return None


def mish(x):
    """Apply Mish elementwise to an arbitrarily-shaped array via a Pallas kernel."""
    orig_shape = x.shape
    orig_dtype = x.dtype
    flat = x.reshape(-1)
    n = flat.shape[0]

    lane = _pick_lane(n)
    padded = False
    if lane is None:
        # Rare fallback: length isn't a multiple of 128. Minimal pad to a
        # multiple of 1024 (costs one extra HBM copy + trailing slice).
        lane = 1024
        pad_to = pl.cdiv(n, lane) * lane
        flat = jnp.pad(flat, (0, pad_to - n))
        padded = True

    rows = flat.shape[0] // lane
    x2d = flat.reshape(rows, lane)

    # Block rows: ~_TARGET_BLOCK_ELEMS elements per block, multiple of 8,
    # or the full (small) row extent when the tensor is small.
    block_rows = max(1, _TARGET_BLOCK_ELEMS // lane)
    if rows <= block_rows or rows < 8:
        block_rows = rows  # full extent — always legal
    else:
        block_rows = max(8, (block_rows // 8) * 8)

    grid = (pl.cdiv(rows, block_rows),)

    out2d = pl.pallas_call(
        _mish_kernel,
        out_shape=jax.ShapeDtypeStruct((rows, lane), orig_dtype),
        grid_spec=pltpu.PrefetchScalarGridSpec(
            num_scalar_prefetch=0,
            grid=grid,
            in_specs=[pl.BlockSpec((block_rows, lane), lambda i: (i, 0))],
            out_specs=pl.BlockSpec((block_rows, lane), lambda i: (i, 0)),
        ),
        compiler_params=pltpu.CompilerParams(
            dimension_semantics=("parallel",),
        ),
    )(x2d)

    out = out2d.reshape(-1)
    if padded:
        out = out[:n]
    return out.reshape(orig_shape)


def mish_ref(x):
    # Pure-JAX reference for verification.
    xf = x.astype(jnp.float32)
    return (xf * jnp.tanh(jax.nn.softplus(xf))).astype(x.dtype)


if __name__ == "__main__":
    key = jax.random.PRNGKey(0)

    # NCHW input, consistent with how Mish is used inside ParticleNetX convs.
    x = jax.random.normal(key, (2, 4, 16, 16), dtype=jnp.float32)
    y = mish(x)
    jax.block_until_ready(y)
    y_ref = mish_ref(x)
    assert y.shape == x.shape and y.dtype == x.dtype
    assert jnp.allclose(y, y_ref, atol=1e-5, rtol=1e-5), "mismatch vs reference"

    # Odd-sized shape to exercise the (rare) non-128-divisible fallback path.
    x2 = jax.random.normal(jax.random.PRNGKey(1), (3, 5, 7, 11), dtype=jnp.float32)
    y2 = mish(x2)
    jax.block_until_ready(y2)
    assert y2.shape == x2.shape and y2.dtype == x2.dtype
    assert jnp.allclose(y2, mish_ref(x2), atol=1e-5, rtol=1e-5), "mismatch (odd shape)"

    print("KERNEL_OK")
</pallas_src>

<mosaic_0001>
module attributes {stable_mosaic.version = 11 : i64} {
  func.func @_mish_kernel(%arg0: i32, %arg1: memref<1x2048xf32, #tpu.memory_space<vmem>>, %arg2: memref<1x2048xf32, #tpu.memory_space<vmem>>) attributes {dimension_semantics = [#tpu.dimension_semantics<parallel>], iteration_bounds = array<i64: 1>, scalar_prefetch = 0 : i64, scratch_operands = 0 : i64, tpu.core_type = #tpu.core_type<tc>, window_params = [{transform_indices = @transform_0, window_bounds = array<i64: 1, 2048>}, {transform_indices = @transform_1, window_bounds = array<i64: 1, 2048>}]} {
    %c0 = arith.constant 0 : index
    %c0_0 = arith.constant 0 : index
    %0 = vector.load %arg1[%c0, %c0_0] : memref<1x2048xf32, #tpu.memory_space<vmem>>, vector<1x2048xf32>
    %cst = arith.constant 2.000000e+01 : f32
    %1 = vector.broadcast %cst : f32 to vector<1x2048xf32>
    %2 = arith.minimumf %0, %1 : vector<1x2048xf32>
    %3 = math.exp %2 : vector<1x2048xf32>
    %cst_1 = arith.constant 2.000000e+00 : f32
    %4 = vector.broadcast %cst_1 : f32 to vector<1x2048xf32>
    %5 = arith.addf %3, %4 : vector<1x2048xf32>
    %6 = arith.mulf %3, %5 : vector<1x2048xf32>
    %cst_2 = arith.constant 2.000000e+00 : f32
    %7 = vector.broadcast %cst_2 : f32 to vector<1x2048xf32>
    %8 = arith.addf %6, %7 : vector<1x2048xf32>
    %9 = arith.divf %6, %8 : vector<1x2048xf32>
    %cst_3 = arith.constant 2.000000e+01 : f32
    %10 = vector.broadcast %cst_3 : f32 to vector<1x2048xf32>
    %11 = arith.cmpf ogt, %0, %10 : vector<1x2048xf32>
    %12 = arith.mulf %0, %9 : vector<1x2048xf32>
    %13 = arith.select %11, %0, %12 : vector<1x2048xi1>, vector<1x2048xf32>
    %c0_4 = arith.constant 0 : index
    %c0_5 = arith.constant 0 : index
    %14 = vector.load %arg2[%c0_4, %c0_5] : memref<1x2048xf32, #tpu.memory_space<vmem>>, vector<1x2048xf32>
    tpu.vector_store %arg2[%c0_4, %c0_5], %13 {strides = array<i32>} : memref<1x2048xf32, #tpu.memory_space<vmem>>, vector<1x2048xf32>,
    return
  }
  func.func @transform_0(%arg0: i32) -> (i32, i32) {
    %c0_i32 = arith.constant 0 : i32
    %c0_i32_0 = arith.constant 0 : i32
    return %arg0, %c0_i32 : i32, i32
  }
  func.func @transform_1(%arg0: i32) -> (i32, i32) {
    %c0_i32 = arith.constant 0 : i32
    %c0_i32_0 = arith.constant 0 : i32
    return %arg0, %c0_i32 : i32, i32
  }
}

</mosaic_0001>

<bundles_post_ra>
// kernel: tpu_custom_call.1
= control target key start
LH: loop header
LB: loop body
LE: loop exit
PB: predicated region body
PF: predicated region fallthrough
CT: control target
= control target key end

     0   :  { %6 = vsyncpa [#allocation3], 0  ;;  %s172_s0 = inlined_call_operand.hbm [shape: f32[1,2048], index: 0, kind: input, shape index: {}]   ;;  %s173_s1 = inlined_call_operand.hbm [shape: f32[1,2048], index: 1, kind: output, shape index: {}]  }
   0x1   :  { %7 = vsyncpa [#allocation4], 0  ;;  %s13_s8 = sshll.u32 %s172_s0, 4  ;;  %s154_s9 = smov [#allocation2]   ;;  %s14_s8 = int_to_ptr.hbm [resolvable:$true] %s13_s8 }
   0x2   :  { %s15_s10 = sshll.u32 %s154_s9, 4  ;;  %s16_s10 = int_to_ptr.vmem [resolvable:$true] %s15_s10 }
   0x3   :  { %18 = dma.hbm_to_vmem [thread:$0]  %s14_s8, 256, %s16_s10, [#allocation3]  }
   0x4   :  { %150 = dma.done.wait [#allocation3], 256  }
   0x5   :  { %151 = vsyncadd [#allocation3], 4294967040  ;;  %v23_v0 = vld [vmem:[#allocation2] sm:$0xff]  ;;  %v24_v1 = vld [vmem:[#allocation2 + $0x8] sm:$0xff]  ;;  %s155_s0 = smov [#allocation5]   ;;  %s82_s14 = sshll.u32 %s173_s1, 4  ;;  %s83_s14 = int_to_ptr.hbm [resolvable:$true] %s82_s14 }
   0x6   :  { %v25_v2 = vmin.f32 %v23_v0, 20.0  ;;  %v26_v3 = vmin.f32 %v24_v1, 20.0  ;;  %vm67_vm8 = vcmp.gt.f32.partialorder %v23_v0, 20.0  ;;  %s80_s11 = sshll.u32 %s155_s0, 4  ;;  %vm68_vm9 = vcmp.gt.f32.partialorder %v24_v1, 20.0  ;;  %s81_s11 = int_to_ptr.vmem [resolvable:$true] %s80_s11 }
   0x8   :  { %v27_v4 = vmul.f32 1.442695, %v25_v2  ;;  %v29_v5 = vmul.f32 1.442695, %v26_v3 }
   0xa   :  { %94 = vpow2.f32 %v27_v4 }
   0xb   :  { %96 = vpow2.f32 %v29_v5 }
  0x10   :  { %v95_v6 = vpop.eup %94 }
  0x11   :  { %v97_v7 = vpop.eup %96  ;;  %v31_v8 = vadd.f32 2.0, %v95_v6 }
  0x12   :  { %v32_v9 = vadd.f32 2.0, %v97_v7 }
  0x13   :  { %v33_v10 = vmul.f32 %v95_v6, %v31_v8 }
  0x14   :  { %v34_v11 = vmul.f32 %v97_v7, %v32_v9 }
  0x15   :  { %v35_v12 = vadd.f32 2.0, %v33_v10 }
  0x16   :  { %v36_v13 = vadd.f32 2.0, %v34_v11 }
  0x17   :  { %98 = vrcp.f32 %v35_v12  ;;  %vm42_vm0 = vweird.f32 %v35_v12  ;;  %v48_v17 = vand.u32 2147483648, %v35_v12  ;;  %v46_v20 = vand.u32 2147483647, %v35_v12 }
  0x18   :  { %100 = vrcp.f32 %v36_v13  ;;  %v63_v21 = vand.u32 2147483648, %v36_v13  ;;  %vm57_vm2 = vweird.f32 %v36_v13  ;;  %v61_v23 = vand.u32 2147483647, %v36_v13 }
  0x19   :  { %v49_v25 = vor.u32 1.1754944e-38, %v48_v17  ;;  %vm47_vm5 = vcmp.eq.f32.partialorder %v46_v20, 8.507059e+37 }
  0x1a   :  { %v64_v28 = vor.u32 1.1754944e-38, %v63_v21  ;;  %vm62_vm7 = vcmp.eq.f32.partialorder %v61_v23, 8.507059e+37 }
  0x1d   :  { %v99_v14 = vpop.eup %98 }
  0x1e   :  { %v101_v15 = vpop.eup %100  ;;  %v38_v16 = vmul.f32 %v99_v14, %v35_v12  ;;  %vm43_vm1 = vweird.f32 %v99_v14 }
  0x1f   :  { %v53_v18 = vmul.f32 %v101_v15, %v36_v13  ;;  %vm58_vm3 = vweird.f32 %v101_v15  ;;  %vm44_vm4 = vmor %vm42_vm0, %vm43_vm1 }
  0x20   :  { %v39_v19 = vsub.f32 1.0, %v38_v16  ;;  %vm59_vm6 = vmor %vm57_vm2, %vm58_vm3 }
  0x21   :  { %v54_v22 = vsub.f32 1.0, %v53_v18 }
  0x22   :  { %v40_v24 = vmul.f32 %v99_v14, %v39_v19 }
  0x23   :  { %v55_v26 = vmul.f32 %v101_v15, %v54_v22 }
  0x24   :  { %v41_v27 = vadd.f32 %v99_v14, %v40_v24 }
  0x25   :  { %v56_v29 = vadd.f32 %v101_v15, %v55_v26 }
  0x26   :  { %v45_v30 = vsel %vm44_vm4, %v99_v14, %v41_v27 }
  0x27   :  { %v50_v31 = vsel %vm47_vm5, %v49_v25, %v45_v30  ;;  %v60_v32 = vsel %vm59_vm6, %v101_v15, %v56_v29 }
  0x28   :  { %v51_v33 = vmul.f32 %v50_v31, %v33_v10  ;;  %v65_v34 = vsel %vm62_vm7, %v64_v28, %v60_v32 }
  0x29   :  { %v66_v35 = vmul.f32 %v65_v34, %v34_v11 }
  0x2a   :  { %v69_v36 = vmul.f32 %v51_v33, %v23_v0 }
  0x2b   :  { %v70_v37 = vmul.f32 %v66_v35, %v24_v1 }
  0x2c   :  { %v71_v38 = vsel %vm67_vm8, %v23_v0, %v69_v36 }
  0x2d   :  { %73 = vst [vmem:[#allocation5] sm:$0xff] %v71_v38  ;;  %v72_v39 = vsel %vm68_vm9, %v24_v1, %v70_v37 }
  0x2e   :  { %74 = vst [vmem:[#allocation5 + $0x8] sm:$0xff] %v72_v39 }
  0x2f   :  { %85 = dma.vmem_to_hbm [thread:$0]  %s81_s11, 256, %s83_s14, [#allocation4]  }
  0x30   :  { %152 = dma.done.wait [#allocation4], 256  }
  0x31   :  { %153 = vsyncadd [#allocation4], 4294967040 }
  0x32   :  { %90 = vsyncpa [#allocation3], 1 }
  0x33   :  { %91 = vsyncpa [#allocation4], 1 }

</bundles_post_ra>
